<compile_context>
chip_gen: v7x
topology: tpu7x:2x2x1
jax: 0.10.0
libtpu: 0.0.40
codegen_flags: <defaults>
</compile_context>

<pallas_src>
import jax
import jax.numpy as jnp
from jax.experimental import pallas as pl
from jax.experimental.pallas import tpu as pltpu

_LANES = 128       # vreg lane width (last-dim tile)
_ROW_GRANULE = 32  # sublane granularity covering f32 (8), bf16 (16), int8 (32)


def _reparameterize_kernel(mu_ref, logsigma_ref, eps_ref, z_ref):
    # All arithmetic in f32 (v5e VPU/EUP have no bf16 path); exp goes to the
    # EUP slot, the FMA to the VPU — both hide under the HBM DMA.
    mu = mu_ref[...].astype(jnp.float32)
    logsigma = logsigma_ref[...].astype(jnp.float32)
    eps = eps_ref[...].astype(jnp.float32)
    std = jnp.exp(0.5 * logsigma)
    z_ref[...] = (eps * std + mu).astype(z_ref.dtype)


def _round_up(x, m):
    return ((x + m - 1) // m) * m


def _reparameterize_tiled(mu2, logsigma2, eps2, out_dtype, max_block_rows):
    """Lane-dense (rows, 128) arrays -> 1-D double-buffered grid."""
    rows = mu2.shape[0]
    # Pick the largest tile <= max_block_rows, but force >= 2 tiles whenever
    # possible so the "parallel" grid axis actually splits across both v7x
    # TensorCores.  2048x128 f32 = 1 MiB per array per buffer -> ~8 MiB of
    # VMEM with 4 arrays double-buffered, within every generation's scoped
    # VMEM default (16 MiB v5e / 32 MiB v6e / 32 MiB v7x).
    block_rows = min(max_block_rows, _round_up(pl.cdiv(rows, 2), _ROW_GRANULE))
    block_rows = min(block_rows, _round_up(rows, _ROW_GRANULE))
    grid = (pl.cdiv(rows, block_rows),)
    spec = pl.BlockSpec((block_rows, _LANES), lambda i: (i, 0))
    return pl.pallas_call(
        _reparameterize_kernel,
        out_shape=jax.ShapeDtypeStruct((rows, _LANES), out_dtype),
        grid=grid,
        in_specs=[spec, spec, spec],
        out_specs=spec,
        compiler_params=pltpu.CompilerParams(
            dimension_semantics=("parallel",)),
    )(mu2, logsigma2, eps2)


def reparameterize(mu: jax.Array, logsigma: jax.Array, key,
                   *, max_block_rows: int = 2048) -> jax.Array:
    """z = eps * exp(0.5 * logsigma) + mu with eps ~ N(0, 1) (reparam trick)."""
    assert mu.shape == logsigma.shape, (mu.shape, logsigma.shape)
    out_dtype = mu.dtype
    # eps ~ N(0,1) in the native dtype (mirrors torch.randn_like(std)); it is
    # streamed straight into the fused kernel — no extra passes over mu/sigma.
    eps = jax.random.normal(key, mu.shape, dtype=mu.dtype)

    n = int(mu.size)
    itemsize = jnp.dtype(mu.dtype).itemsize

    if n % _LANES == 0 and (n // _LANES) >= 2 * _ROW_GRANULE:
        # Common case: free contiguous reshape to a lane-dense slab, no pad,
        # no output slice.
        rows = n // _LANES
        z2 = _reparameterize_tiled(
            mu.reshape(rows, _LANES), logsigma.reshape(rows, _LANES),
            eps.reshape(rows, _LANES), out_dtype, max_block_rows)
        return z2.reshape(mu.shape)

    if n * itemsize <= 4 * 1024 * 1024:
        # Small / unaligned [B x D] latent: single full-shape block (full
        # array dims waive the (8,128) divisibility rule) — no padding copies.
        shape2 = mu.shape if mu.ndim >= 2 else (1, n)
        z2 = pl.pallas_call(
            _reparameterize_kernel,
            out_shape=jax.ShapeDtypeStruct(shape2, out_dtype),
        )(mu.reshape(shape2), logsigma.reshape(shape2), eps.reshape(shape2))
        return z2.reshape(mu.shape)

    # Rare: large AND unaligned.  Pad the flat arrays to a multiple of 128
    # (one extra copy per array) and reuse the tiled path.
    padded = _round_up(n, _LANES)
    rows = padded // _LANES

    def _prep(a):
        return jnp.pad(a.reshape(-1), (0, padded - n)).reshape(rows, _LANES)

    z2 = _reparameterize_tiled(_prep(mu), _prep(logsigma), _prep(eps),
                               out_dtype, max_block_rows)
    return z2.reshape(-1)[:n].reshape(mu.shape)


if __name__ == "__main__":
    B, D = 2, 32  # [B x D] latent Gaussian, as documented in the module

    root = jax.random.PRNGKey(0)
    k_mu, k_ls, k_eps = jax.random.split(root, 3)
    mu = jax.random.normal(k_mu, (B, D), dtype=jnp.float32)
    logsigma = jax.random.normal(k_ls, (B, D), dtype=jnp.float32)

    z = jax.block_until_ready(reparameterize(mu, logsigma, k_eps))
    assert z.shape == (B, D)
    assert bool(jnp.all(jnp.isfinite(z)))

    # Determinism: same key -> identical samples.
    z_again = jax.block_until_ready(reparameterize(mu, logsigma, k_eps))
    assert jnp.array_equal(z, z_again)

    # Exact correctness vs. a pure-JAX reference using the same eps stream.
    eps_ref = jax.random.normal(k_eps, (B, D), dtype=jnp.float32)
    z_ref = eps_ref * jnp.exp(0.5 * logsigma) + mu
    assert jnp.allclose(z, z_ref, atol=1e-6, rtol=1e-6)

    # Multi-tile lane-dense path (exercises the tiled grid / double buffering
    # and the >=2-tile split): mu = 0, logsigma = 0 -> z = eps ~ N(0,1).
    big_shape = (1024, 256)  # 262,144 samples -> (2048, 128) slab, 2 tiles
    zeros = jnp.zeros(big_shape, dtype=jnp.float32)
    z_big = jax.block_until_ready(
        reparameterize(zeros, zeros, jax.random.PRNGKey(7)))
    assert z_big.shape == big_shape
    assert bool(jnp.all(jnp.isfinite(z_big)))
    assert abs(float(z_big.mean())) < 0.02
    assert abs(float(z_big.std()) - 1.0) < 0.02

    print("KERNEL_OK")
</pallas_src>

<mosaic_0001>
module attributes {stable_mosaic.version = 11 : i64} {
  func.func @_reparameterize_kernel(%arg0: memref<2x32xf32, #tpu.memory_space<vmem>>, %arg1: memref<2x32xf32, #tpu.memory_space<vmem>>, %arg2: memref<2x32xf32, #tpu.memory_space<vmem>>, %arg3: memref<2x32xf32, #tpu.memory_space<vmem>>) attributes {dimension_semantics = [], scalar_prefetch = 0 : i64, scratch_operands = 0 : i64, tpu.core_type = #tpu.core_type<tc>} {
    %c0 = arith.constant 0 : index
    %c0_0 = arith.constant 0 : index
    %0 = vector.load %arg0[%c0, %c0_0] : memref<2x32xf32, #tpu.memory_space<vmem>>, vector<2x32xf32>
    %c0_1 = arith.constant 0 : index
    %c0_2 = arith.constant 0 : index
    %1 = vector.load %arg1[%c0_1, %c0_2] : memref<2x32xf32, #tpu.memory_space<vmem>>, vector<2x32xf32>
    %c0_3 = arith.constant 0 : index
    %c0_4 = arith.constant 0 : index
    %2 = vector.load %arg2[%c0_3, %c0_4] : memref<2x32xf32, #tpu.memory_space<vmem>>, vector<2x32xf32>
    %cst = arith.constant 5.000000e-01 : f32
    %3 = vector.broadcast %cst : f32 to vector<2x32xf32>
    %4 = arith.mulf %3, %1 : vector<2x32xf32>
    %5 = math.exp %4 : vector<2x32xf32>
    %6 = arith.mulf %2, %5 : vector<2x32xf32>
    %7 = arith.addf %6, %0 : vector<2x32xf32>
    %c0_5 = arith.constant 0 : index
    %c0_6 = arith.constant 0 : index
    %8 = vector.load %arg3[%c0_5, %c0_6] : memref<2x32xf32, #tpu.memory_space<vmem>>, vector<2x32xf32>
    tpu.vector_store %arg3[%c0_5, %c0_6], %7 {strides = array<i32>} : memref<2x32xf32, #tpu.memory_space<vmem>>, vector<2x32xf32>,
    return
  }
}

</mosaic_0001>

<bundles_post_ra>
// kernel: tpu_custom_call.1
= control target key start
LH: loop header
LB: loop body
LE: loop exit
PB: predicated region body
PF: predicated region fallthrough
CT: control target
= control target key end

     0   :  { %8 = vsyncpa [#allocation3], 0  ;;  %s156_s0 = inlined_call_operand.hbm [shape: f32[2,32], index: 0, kind: input, shape index: {}]   ;;  %s157_s1 = inlined_call_operand.vmem [shape: f32[2,32], index: 1, kind: input, shape index: {}]   ;;  %s158_s2 = inlined_call_operand.vmem [shape: f32[2,32], index: 2, kind: input, shape index: {}]   ;;  %s159_s3 = inlined_call_operand.hbm [shape: f32[2,32], index: 3, kind: output, shape index: {}]  }
   0x1   :  { %9 = vsyncpa [#allocation4], 0  ;;  %s104_s12 = smov [#allocation2]   ;;  %s56_s16 = scalar_lea.hbm %s156_s0, 32 }
   0x2   :  { %s16_s13 = sshll.u32 %s104_s12, 4  ;;  %p57_p0 = scmp.ne.s32.totalorder %s156_s0, %s56_s16  ;;  %s17_s13 = int_to_ptr.vmem [resolvable:$true] %s16_s13 }
   0x3   :  { %p60_p1 = scmp.lt.u32.totalorder %s56_s16, %s156_s0 }
   0x5   :  { %p62_p2 = pnand %p60_p1, %p57_p0 }
   0x7   :  { %65 = shalt.err (!%p62_p2)
}
   0x8   :  { %s66_s21 = scalar_lea.vmem %s17_s13, 32  ;;  %p71_p4 = scmp.lt.s32.totalorder %s17_s13, %s17_s13 }
   0x9   :  { %p67_p3 = scmp.ne.s32.totalorder %s17_s13, %s66_s21  ;;  %p72_p5 = scmp.lt.s32.totalorder %s66_s21, %s66_s21 }
   0xb   :  { %p73_p6 = por %p72_p5, %p71_p4 }
   0xd   :  { %p74_p7 = pnand %p73_p6, %p67_p3 }
   0xf   :  { %77 = shalt.err (!%p74_p7)
}
  0x10   :  { %19 = dma.hbm_to_vmem [thread:$0]  %s156_s0, 32, %s17_s13, [#allocation3]  }
  0x11   :  { %100 = dma.done.wait [#allocation3], 32  }
  0x12   :  { %101 = vsyncadd [#allocation3], 4294967264  ;;  %v28_v0 = vld [vmem:[%s157_s1] sm:$0x3]  ;;  %s105_s28 = smov [#allocation5]   ;;  %vm35_vm0 = vcmask 254976  }
  0x13   :  { %v30_v1 = vmul.f32 0.5, %v28_v0  ;;  %v29_v3 = vld [vmem:[%s158_s2] sm:$0x3]  ;;  %s43_s29 = sshll.u32 %s105_s28, 4  ;;  %s44_s29 = int_to_ptr.vmem [resolvable:$true] %s43_s29 }
  0x14   :  { %v27_v5 = vld [vmem:[#allocation2] sm:$0x3]  ;;  %s78_s0 = scalar_lea.vmem %s44_s29, 32  ;;  %p83_p9 = scmp.lt.s32.totalorder %s44_s29, %s44_s29 }
  0x15   :  { %v31_v2 = vmul.f32 1.442695, %v30_v1  ;;  %p79_p8 = scmp.ne.s32.totalorder %s44_s29, %s78_s0  ;;  %p84_p10 = scmp.lt.s32.totalorder %s78_s0, %s78_s0 }
  0x17   :  { %54 = vpow2.f32 %v31_v2  ;;  %p85_p11 = por %p84_p10, %p83_p9 }
  0x19   :  { %p86_p12 = pnand %p85_p11, %p79_p8 }
  0x21   :  { %v55_v4 = vpop.eup %54 }
  0x22   :  { %v33_v6 = vmul.f32 %v55_v4, %v29_v3 }
  0x24   :  { %v34_v7 = vadd.f32 %v33_v6, %v27_v5 }
  0x26   :  { %36 = vst.msk [vmem:[#allocation5] sm:$0x3] %vm35_vm0, %v34_v7 }
  0x27   :  { %89 = shalt.err (!%p86_p12)
}
  0x28   :  { %s90_s2 = scalar_lea.hbm %s159_s3, 32 }
  0x29   :  { %p91_p13 = scmp.ne.s32.totalorder %s159_s3, %s90_s2  ;;  %p94_p0 = scmp.lt.u32.totalorder %s90_s2, %s159_s3 }
  0x2b   :  { %p96_p1 = pnand %p94_p0, %p91_p13 }
  0x2d   :  { %99 = shalt.err (!%p96_p1)
}
  0x2e   :  { %46 = dma.vmem_to_hbm [thread:$0]  %s44_s29, 32, %s159_s3, [#allocation4]  }
  0x2f   :  { %102 = dma.done.wait [#allocation4], 32  }
  0x30   :  { %103 = vsyncadd [#allocation4], 4294967264 }
  0x31   :  { %50 = vsyncpa [#allocation3], 1 }
  0x32   :  { %51 = vsyncpa [#allocation4], 1 }

</bundles_post_ra>
